<compile_context>
chip_gen: v7x
topology: tpu7x:2x2x1
jax: 0.10.0
libtpu: 0.0.40
codegen_flags: <defaults>
</compile_context>

<pallas_src>
import jax
import jax.numpy as jnp
from jax.experimental import pallas as pl
from jax.experimental.pallas import tpu as pltpu

_LANE = 128


def _round_up(x, m):
    return (x + m - 1) // m * m


def _heads_kernel(act_ref, stop_ref, act_out_ref, stop_out_ref):
    """Fused lane-dense log-softmax heads.

    act_ref:  (a, TL) -- log_softmax over axis 0 (sublanes, width a).
    stop_ref: (2, TL) -- width-2 log_softmax via softplus of the row diff.
    Rows (= B*b option rows) live on the 128-lane axis, so every vreg is
    lane-dense and output stores are unmasked.
    """
    # Action head: numerically stable log_softmax over the small sublane axis.
    x = act_ref[...].astype(jnp.float32)
    m = jnp.max(x, axis=0, keepdims=True)
    z = x - m
    lse = jnp.log(jnp.sum(jnp.exp(z), axis=0, keepdims=True))
    act_out_ref[...] = (z - lse).astype(act_out_ref.dtype)

    # Stop head: log_softmax([x0, x1]) = [-softplus(x1 - x0), -softplus(x0 - x1)]
    # with softplus(d) = relu(d) + log(1 + exp(-|d|)) (stable; shares one
    # exp/log pair per row).
    s = stop_ref[...].astype(jnp.float32)
    d = s[1:2, :] - s[0:1, :]                       # (1, TL)
    t = jnp.log(1.0 + jnp.exp(-jnp.abs(d)))
    out0 = -(jnp.maximum(d, 0.0) + t)               # -softplus(d)
    out1 = -(jnp.maximum(-d, 0.0) + t)              # -softplus(-d)
    stop_out_ref[...] = jnp.concatenate([out0, out1], axis=0).astype(
        stop_out_ref.dtype
    )


def _vmem_limit_bytes():
    """Scoped-VMEM limit: half the physical per-core VMEM (32 MiB on v7x's
    64 MiB, 64 MiB on v5e/v6e's 128 MiB), conservative fallback if the query
    is unavailable."""
    try:
        cap = int(pltpu.get_tpu_info().vmem_capacity_bytes)
    except Exception:  # conservative (v7x-sized) fallback
        cap = 64 << 20
    return max(4 << 20, min(cap // 2, 64 << 20))


def _choose_lane_tiling(rows, a, itemsize, vmem_limit):
    """Pick (lane_tile, grid_steps) for the lane-dense heads kernel.

    VMEM accounting uses the *padded* layout: an (a, TL) block occupies
    round_up(a, sublane_tile) sublanes regardless of a, i.e. padded bytes per
    lane-column, summed over the 4 blocks (2 in + 2 out) and double-buffered
    by the BlockSpec pipeline.
    """
    sub_tile = max(1, 32 // itemsize)          # 8 for f32, 16 for bf16
    pad_a = _round_up(a, sub_tile)
    pad_s = _round_up(2, sub_tile)
    bytes_per_lane = 2 * 2 * (pad_a + pad_s) * itemsize   # (in+out) x 2 buffers
    budget = vmem_limit // 2                   # headroom for f32 temps/scratch
    tl_cap = max(_LANE, (budget // max(bytes_per_lane, 1)) // _LANE * _LANE)

    if rows <= 4 * _LANE:
        # Tiny inputs (the module's actual scale): one full-extent block; a
        # forced split would only add ~0.35us/step of grid overhead
        # (single-TC v5e/v6e gain nothing from splitting here).
        return rows, 1
    # Streaming: VMEM-budgeted lane tiles (multiple of 128), but at least ~4
    # grid steps so each TensorCore (2 on v7x) has prefetch/writeback steps to
    # overlap with compute.  The ragged last block is masked by Pallas.
    tl = min(tl_cap, max(_LANE, _round_up(pl.cdiv(rows, 4), _LANE)))
    return tl, pl.cdiv(rows, tl)


def actions_and_stops_head_lanedense(act_t, stp_t):
    """Fused log-softmax heads on lane-dense (transposed) features.

    act_t: (a, R) action features, stp_t: (2, R) stop features, with
    R = B*b option rows on the lane axis.  Returns log-probs in the same
    layout.  Zero-copy entry point for a backbone whose final linear emits
    the transposed (features, rows) layout.
    """
    a, rows = act_t.shape
    two, rows2 = stp_t.shape
    assert two == 2 and rows2 == rows
    dtype = act_t.dtype
    itemsize = jnp.dtype(dtype).itemsize

    vmem_limit = _vmem_limit_bytes()
    tl, gsteps = _choose_lane_tiling(rows, a, itemsize, vmem_limit)

    elems = rows * (a + 2)
    cost = pl.CostEstimate(
        flops=int(4 * rows * a + 6 * rows),          # sub/add/max chains
        transcendentals=int(rows * a + 3 * rows),    # exp per elem + log/exp per row
        bytes_accessed=int(2 * elems * itemsize),    # read + write (mem-bound)
    )

    act_out, stop_out = pl.pallas_call(
        _heads_kernel,
        out_shape=(
            jax.ShapeDtypeStruct((a, rows), dtype),
            jax.ShapeDtypeStruct((2, rows), dtype),
        ),
        grid=(gsteps,),
        in_specs=[
            pl.BlockSpec((a, tl), lambda i: (0, i)),
            pl.BlockSpec((2, tl), lambda i: (0, i)),
        ],
        out_specs=(
            pl.BlockSpec((a, tl), lambda i: (0, i)),
            pl.BlockSpec((2, tl), lambda i: (0, i)),
        ),
        compiler_params=pltpu.CompilerParams(
            dimension_semantics=("parallel",),
            vmem_limit_bytes=int(vmem_limit),
        ),
        cost_estimate=cost,
    )(act_t, stp_t)
    return act_out, stop_out


def actions_and_stops_head_forward(feats, a, b):
    """Pallas equivalent of ActionsAndStopsMicroNet.forward on the backbone
    output `feats` of shape (B, a*b + 2*b).

    Returns (action_logps (B, b, a), stop_logps (B, b, 2)).

    TODO(synk): the XLA repack below (slice + contiguous reshape + one
    transpose) becomes free if the backbone's final linear writes its output
    in the transposed (features, rows) layout consumed by
    actions_and_stops_head_lanedense (transpose its weight).
    """
    B, out_dim = feats.shape
    assert out_dim == a * b + 2 * b, "feats must have a*b + 2*b features"
    rows = B * b

    # Lane-dense repack: option rows (B*b) onto the 128-lane axis, softmax
    # widths onto sublanes.  '(b a)' / '(b two)' splits are free contiguous
    # reshapes; the transpose is one XLA pass over the (small) head data.
    act_t = feats[:, : a * b].reshape(rows, a).T    # (a, R)
    stp_t = feats[:, a * b :].reshape(rows, 2).T    # (2, R)

    act_out_t, stop_out_t = actions_and_stops_head_lanedense(act_t, stp_t)

    action_logps = act_out_t.T.reshape(B, b, a)
    stop_logps = stop_out_t.T.reshape(B, b, 2)
    return action_logps, stop_logps


if __name__ == "__main__":
    key = jax.random.PRNGKey(0)

    # Shapes implied by the forward: a = 4 box_world actions, b = 8 abstract
    # options, batch = 2; backbone output dim = a*b + 2*b = 48.
    B, a, b = 2, 4, 8
    out_dim = a * b + 2 * b
    feats = jax.random.normal(key, (B, out_dim), dtype=jnp.float32)

    action_logps, stop_logps = actions_and_stops_head_forward(feats, a, b)
    action_logps, stop_logps = jax.block_until_ready((action_logps, stop_logps))

    # Reference (same semantics as the torch forward head).
    act_ref = jax.nn.log_softmax(feats[:, : a * b].reshape(B, b, a), axis=-1)
    stop_ref = jax.nn.log_softmax(feats[:, a * b :].reshape(B, b, 2), axis=-1)
    assert action_logps.shape == (B, b, a)
    assert stop_logps.shape == (B, b, 2)
    assert jnp.allclose(action_logps, act_ref, atol=1e-5, rtol=1e-5), "action mismatch"
    assert jnp.allclose(stop_logps, stop_ref, atol=1e-5, rtol=1e-5), "stop mismatch"

    # Larger batch: exercises the multi-step, ragged-last-block path
    # (grid = cdiv(R, lane_tile); no host-side padding pass).
    B2 = 300                                      # R = 2400 -> 4 lane tiles of 640
    feats2 = jax.random.normal(jax.random.PRNGKey(1), (B2, out_dim), jnp.float32)
    a2_lp, s2_lp = actions_and_stops_head_forward(feats2, a, b)
    a2_lp, s2_lp = jax.block_until_ready((a2_lp, s2_lp))
    a2_ref = jax.nn.log_softmax(feats2[:, : a * b].reshape(B2, b, a), axis=-1)
    s2_ref = jax.nn.log_softmax(feats2[:, a * b :].reshape(B2, b, 2), axis=-1)
    assert jnp.allclose(a2_lp, a2_ref, atol=1e-5, rtol=1e-5), "action mismatch (big)"
    assert jnp.allclose(s2_lp, s2_ref, atol=1e-5, rtol=1e-5), "stop mismatch (big)"

    print("KERNEL_OK")
</pallas_src>

<mosaic_0001>
module attributes {stable_mosaic.version = 11 : i64} {
  func.func @_heads_kernel(%arg0: i32, %arg1: memref<4x16xf32, #tpu.memory_space<vmem>>, %arg2: memref<2x16xf32, #tpu.memory_space<vmem>>, %arg3: memref<4x16xf32, #tpu.memory_space<vmem>>, %arg4: memref<2x16xf32, #tpu.memory_space<vmem>>) attributes {dimension_semantics = [#tpu.dimension_semantics<parallel>], iteration_bounds = array<i64: 1>, scalar_prefetch = 0 : i64, scratch_operands = 0 : i64, tpu.core_type = #tpu.core_type<tc>, window_params = [{transform_indices = @transform_0, window_bounds = array<i64: 4, 16>}, {transform_indices = @transform_1, window_bounds = array<i64: 2, 16>}, {transform_indices = @transform_2, window_bounds = array<i64: 4, 16>}, {transform_indices = @transform_3, window_bounds = array<i64: 2, 16>}]} {
    %c0 = arith.constant 0 : index
    %c0_0 = arith.constant 0 : index
    %0 = vector.load %arg1[%c0, %c0_0] : memref<4x16xf32, #tpu.memory_space<vmem>>, vector<4x16xf32>
    %cst = arith.constant dense<0xFF800000> : vector<16xf32>
    %1 = vector.multi_reduction <maximumf>, %0, %cst [0] : vector<4x16xf32> to vector<16xf32>
    %2 = vector.shape_cast %1 : vector<16xf32> to vector<1x16xf32>
    %3 = vector.broadcast %2 : vector<1x16xf32> to vector<4x16xf32>
    %4 = arith.subf %0, %3 : vector<4x16xf32>
    %5 = math.exp %4 : vector<4x16xf32>
    %cst_1 = arith.constant dense<0.000000e+00> : vector<16xf32>
    %6 = vector.multi_reduction <add>, %5, %cst_1 [0] : vector<4x16xf32> to vector<16xf32>
    %7 = vector.shape_cast %6 : vector<16xf32> to vector<1x16xf32>
    %8 = math.log %7 : vector<1x16xf32>
    %9 = vector.broadcast %8 : vector<1x16xf32> to vector<4x16xf32>
    %10 = arith.subf %4, %9 : vector<4x16xf32>
    %c0_2 = arith.constant 0 : index
    %c0_3 = arith.constant 0 : index
    %11 = vector.load %arg3[%c0_2, %c0_3] : memref<4x16xf32, #tpu.memory_space<vmem>>, vector<4x16xf32>
    tpu.vector_store %arg3[%c0_2, %c0_3], %10 {strides = array<i32>} : memref<4x16xf32, #tpu.memory_space<vmem>>, vector<4x16xf32>,
    %c0_4 = arith.constant 0 : index
    %c0_5 = arith.constant 0 : index
    %12 = vector.load %arg2[%c0_4, %c0_5] : memref<2x16xf32, #tpu.memory_space<vmem>>, vector<2x16xf32>
    %13 = vector.extract_strided_slice %12 {offsets = [1, 0], sizes = [1, 16], strides = [1, 1]} : vector<2x16xf32> to vector<1x16xf32>
    %14 = vector.extract_strided_slice %12 {offsets = [0, 0], sizes = [1, 16], strides = [1, 1]} : vector<2x16xf32> to vector<1x16xf32>
    %15 = arith.subf %13, %14 : vector<1x16xf32>
    %16 = math.absf %15 : vector<1x16xf32>
    %cst_6 = arith.constant 0.000000e+00 : f32
    %17 = vector.broadcast %cst_6 : f32 to vector<1x16xf32>
    %18 = arith.subf %17, %16 : vector<1x16xf32>
    %19 = math.exp %18 : vector<1x16xf32>
    %cst_7 = arith.constant 1.000000e+00 : f32
    %20 = vector.broadcast %cst_7 : f32 to vector<1x16xf32>
    %21 = arith.addf %20, %19 : vector<1x16xf32>
    %22 = math.log %21 : vector<1x16xf32>
    %cst_8 = arith.constant 0.000000e+00 : f32
    %23 = vector.broadcast %cst_8 : f32 to vector<1x16xf32>
    %24 = arith.maximumf %15, %23 : vector<1x16xf32>
    %25 = arith.addf %24, %22 : vector<1x16xf32>
    %cst_9 = arith.constant 0.000000e+00 : f32
    %26 = vector.broadcast %cst_9 : f32 to vector<1x16xf32>
    %27 = arith.subf %26, %25 : vector<1x16xf32>
    %cst_10 = arith.constant 0.000000e+00 : f32
    %28 = vector.broadcast %cst_10 : f32 to vector<1x16xf32>
    %29 = arith.subf %28, %15 : vector<1x16xf32>
    %cst_11 = arith.constant 0.000000e+00 : f32
    %30 = vector.broadcast %cst_11 : f32 to vector<1x16xf32>
    %31 = arith.maximumf %29, %30 : vector<1x16xf32>
    %32 = arith.addf %31, %22 : vector<1x16xf32>
    %cst_12 = arith.constant 0.000000e+00 : f32
    %33 = vector.broadcast %cst_12 : f32 to vector<1x16xf32>
    %34 = arith.subf %33, %32 : vector<1x16xf32>
    %35 = tpu.concatenate %27, %34 in 0 : vector<1x16xf32>, vector<1x16xf32> -> vector<2x16xf32>
    %c0_13 = arith.constant 0 : index
    %c0_14 = arith.constant 0 : index
    %36 = vector.load %arg4[%c0_13, %c0_14] : memref<2x16xf32, #tpu.memory_space<vmem>>, vector<2x16xf32>
    tpu.vector_store %arg4[%c0_13, %c0_14], %35 {strides = array<i32>} : memref<2x16xf32, #tpu.memory_space<vmem>>, vector<2x16xf32>,
    return
  }
  func.func @transform_0(%arg0: i32) -> (i32, i32) {
    %c0_i32 = arith.constant 0 : i32
    %c0_i32_0 = arith.constant 0 : i32
    return %c0_i32, %arg0 : i32, i32
  }
  func.func @transform_1(%arg0: i32) -> (i32, i32) {
    %c0_i32 = arith.constant 0 : i32
    %c0_i32_0 = arith.constant 0 : i32
    return %c0_i32, %arg0 : i32, i32
  }
  func.func @transform_2(%arg0: i32) -> (i32, i32) {
    %c0_i32 = arith.constant 0 : i32
    %c0_i32_0 = arith.constant 0 : i32
    return %c0_i32, %arg0 : i32, i32
  }
  func.func @transform_3(%arg0: i32) -> (i32, i32) {
    %c0_i32 = arith.constant 0 : i32
    %c0_i32_0 = arith.constant 0 : i32
    return %c0_i32, %arg0 : i32, i32
  }
}

</mosaic_0001>

<bundles_post_ra>
// kernel: tpu_custom_call.1
= control target key start
LH: loop header
LB: loop body
LE: loop exit
PB: predicated region body
PF: predicated region fallthrough
CT: control target
= control target key end

     0   :  { %9 = vsyncpa [#allocation3], 0  ;;  %s253_s0 = inlined_call_operand.hbm [shape: f32[4,16], index: 0, kind: input, shape index: {}]   ;;  %s254_s1 = inlined_call_operand.vmem [shape: f32[2,16], index: 1, kind: input, shape index: {}]   ;;  %s255_s2 = inlined_call_operand.hbm [shape: f32[4,16], index: 2, kind: output, shape index: {0}]   ;;  %s256_s3 = inlined_call_operand.hbm [shape: f32[2,16], index: 3, kind: output, shape index: {1}]  }
   0x1   :  { %10 = vsyncpa [#allocation4], 0 }
   0x2   :  { %11 = vsyncpa [#allocation7], 0  ;;  %s188_s12 = smov [#allocation2]   ;;  %s116_s16 = scalar_lea.hbm %s253_s0, 64 }
   0x3   :  { %s18_s13 = sshll.u32 %s188_s12, 4  ;;  %p117_p0 = scmp.ne.s32.totalorder %s253_s0, %s116_s16  ;;  %s19_s13 = int_to_ptr.vmem [resolvable:$true] %s18_s13 }
   0x4   :  { %p120_p1 = scmp.lt.u32.totalorder %s116_s16, %s253_s0 }
   0x6   :  { %p122_p2 = pnand %p120_p1, %p117_p0 }
   0x8   :  { %125 = shalt.err (!%p122_p2)
}
   0x9   :  { %s126_s21 = scalar_lea.vmem %s19_s13, 64  ;;  %p131_p4 = scmp.lt.s32.totalorder %s19_s13, %s19_s13 }
   0xa   :  { %p127_p3 = scmp.ne.s32.totalorder %s19_s13, %s126_s21  ;;  %p132_p5 = scmp.lt.s32.totalorder %s126_s21, %s126_s21 }
   0xc   :  { %p133_p6 = por %p132_p5, %p131_p4 }
   0xe   :  { %p134_p7 = pnand %p133_p6, %p127_p3 }
  0x10   :  { %137 = shalt.err (!%p134_p7)
}
  0x11   :  { %21 = dma.hbm_to_vmem [thread:$0]  %s253_s0, 64, %s19_s13, [#allocation3]  }
  0x12   :  { %182 = dma.done.wait [#allocation3], 64  }
  0x13   :  { %183 = vsyncadd [#allocation3], 4294967232  ;;  %vm28_vm0 = vcmask 125952   ;;  %v27_v0 = vld [vmem:[#allocation2] sm:$0xf]  ;;  %s189_s0 = smov [#allocation6]  }
  0x14   :  { %v50_v1 = vld [vmem:[%s254_s1] sm:$0x3]  ;;  %v29_v2 = vsel %vm28_vm0, %v27_v0, -inf  ;;  %s92_s1 = sshll.u32 %s189_s0, 4  ;;  %vm72_vm1 = vcmask 1040384   ;;  %vm74_vm2 = vcmask 123904   ;;  %s93_s1 = int_to_ptr.vmem [resolvable:$true] %s92_s1 }
  0x15   :  { %v52_v3 = vrot.slane %v50_v1, 7  ;;  %v30_v4 = vrot.slane %v29_v2, 4  ;;  %s138_s26 = scalar_lea.vmem %s93_s1, 32  ;;  %p143_p9 = scmp.lt.s32.totalorder %s93_s1, %s93_s1 }
  0x16   :  { %p139_p8 = scmp.ne.s32.totalorder %s93_s1, %s138_s26  ;;  %p144_p10 = scmp.lt.s32.totalorder %s138_s26, %s138_s26 }
  0x17   :  { %v54_v5 = vsub.f32 %v50_v1, %v52_v3  ;;  %v31_v6 = vmax.f32 %v29_v2, %v30_v4 }
  0x18   :  { %p145_p11 = por %p144_p10, %p143_p9 }
  0x19   :  { %v55_v7 = vand.u32 2147483647, %v54_v5  ;;  %v32_v8 = vrot.slane %v31_v6, 2  ;;  %v65_v20 = vsub.f32 0.0, %v54_v5  ;;  %v62_v23 = vmax.f32 %v54_v5, 0.0 }
  0x1a   :  { %p146_p12 = pnand %p145_p11, %p139_p8 }
  0x1b   :  { %v56_v9 = vsub.f32 0.0, %v55_v7  ;;  %v33_v10 = vmax.f32 %v31_v6, %v32_v8  ;;  %v66_v24 = vmax.f32 %v65_v20, 0.0 }
  0x1d   :  { %v57_v11 = vmul.f32 1.442695, %v56_v9  ;;  %v34_v12 = vrot.slane %v33_v10, 1 }
  0x1f   :  { %108 = vpow2.f32 %v57_v11  ;;  %v35_v13 = vmax.f32 %v33_v10, %v34_v12 }
  0x21   :  { %v36_v14 = vsub.f32 %v27_v0, %v35_v13 }
  0x23   :  { %v37_v15 = vmul.f32 1.442695, %v36_v14 }
  0x25   :  { %110 = vpow2.f32 %v37_v15 }
  0x29   :  { %v109_v16 = vpop.eup %108 }
  0x2a   :  { %v59_v17 = vadd.f32 1.0, %v109_v16 }
  0x2c   :  { %112 = vlog2.f32 %v59_v17 }
  0x2f   :  { %v111_v18 = vpop.eup %110 }
  0x30   :  { %v39_v19 = vsel %vm28_vm0, %v111_v18, 0.0 }
  0x31   :  { %v40_v21 = vrot.slane %v39_v19, 4 }
  0x33   :  { %v41_v22 = vadd.f32 %v40_v21, %v39_v19 }
  0x35   :  { %v42_v26 = vrot.slane %v41_v22, 2 }
  0x36   :  { %v113_v25 = vpop.eup %112 }
  0x37   :  { %v61_v27 = vmul.f32 0.6931472, %v113_v25  ;;  %v43_v28 = vadd.f32 %v42_v26, %v41_v22 }
  0x39   :  { %v63_v29 = vadd.f32 %v62_v23, %v61_v27  ;;  %v67_v30 = vadd.f32 %v66_v24, %v61_v27  ;;  %v44_v31 = vrot.slane %v43_v28, 1 }
  0x3b   :  { %v64_v32 = vsub.f32 0.0, %v63_v29  ;;  %v68_v33 = vsub.f32 0.0, %v67_v30  ;;  %v45_v34 = vadd.f32 %v44_v31, %v43_v28 }
  0x3d   :  { %v70_v35 = vrot.slane %v64_v32, 1  ;;  %114 = vlog2.f32 %v45_v34 }
  0x3f   :  { %v73_v36 = vsel %vm72_vm1, %v70_v35, %v68_v33 }
  0x40   :  { %75 = vst.msk [vmem:[#allocation6] sm:$0x3] %vm74_vm2, %v73_v36 }
  0x41   :  { %149 = shalt.err (!%p146_p12)
}
  0x42   :  { %s150_s29 = scalar_lea.hbm %s256_s3, 32 }
  0x43   :  { %p151_p13 = scmp.ne.s32.totalorder %s256_s3, %s150_s29  ;;  %p154_p0 = scmp.lt.u32.totalorder %s150_s29, %s256_s3 }
  0x45   :  { %p156_p1 = pnand %p154_p0, %p151_p13 }
  0x47   :  { %159 = shalt.err (!%p156_p1)
}
  0x48   :  { %95 = dma.vmem_to_hbm [thread:$0]  %s93_s1, 32, %s256_s3, [#allocation7]   ;;  %v115_v37 = vpop.eup %114 }
  0x49   :  { %s190_s9 = smov [#allocation5]   ;;  %v47_v38 = vmul.f32 0.6931472, %v115_v37 }
  0x4a   :  { %s82_s10 = sshll.u32 %s190_s9, 4  ;;  %s83_s10 = int_to_ptr.vmem [resolvable:$true] %s82_s10 }
  0x4b   :  { %v48_v39 = vsub.f32 %v36_v14, %v47_v38  ;;  %s160_s11 = scalar_lea.vmem %s83_s10, 64  ;;  %p165_p3 = scmp.lt.s32.totalorder %s83_s10, %s83_s10 }
  0x4c   :  { %p161_p2 = scmp.ne.s32.totalorder %s83_s10, %s160_s11  ;;  %p166_p4 = scmp.lt.s32.totalorder %s160_s11, %s160_s11 }
  0x4d   :  { %49 = vst.msk [vmem:[#allocation5] sm:$0xf] %vm28_vm0, %v48_v39 }
  0x4e   :  { %p167_p5 = por %p166_p4, %p165_p3 }
  0x50   :  { %p168_p6 = pnand %p167_p5, %p161_p2 }
  0x52   :  { %171 = shalt.err (!%p168_p6)
}
  0x53   :  { %s172_s14 = scalar_lea.hbm %s255_s2, 64 }
  0x54   :  { %p173_p7 = scmp.ne.s32.totalorder %s255_s2, %s172_s14  ;;  %p176_p8 = scmp.lt.u32.totalorder %s172_s14, %s255_s2 }
  0x56   :  { %p178_p9 = pnand %p176_p8, %p173_p7 }
  0x58   :  { %181 = shalt.err (!%p178_p9)
}
  0x59   :  { %85 = dma.vmem_to_hbm [thread:$0]  %s83_s10, 64, %s255_s2, [#allocation4]  }
  0x5a   :  { %184 = dma.done.wait [#allocation4], 64  }
  0x5b   :  { %185 = vsyncadd [#allocation4], 4294967232 }
  0x5c   :  { %186 = dma.done.wait [#allocation7], 32  }
  0x5d   :  { %187 = vsyncadd [#allocation7], 4294967264 }
  0x5e   :  { %102 = vsyncpa [#allocation3], 1 }
  0x5f   :  { %103 = vsyncpa [#allocation4], 1 }
  0x60   :  { %104 = vsyncpa [#allocation7], 1 }

</bundles_post_ra>
